<compile_context>
chip_gen: v5e
topology: v5e:2x2
jax: 0.10.0
libtpu: 0.0.40
codegen_flags: <defaults>
</compile_context>

<pallas_src>
import jax
import jax.numpy as jnp
from jax.experimental import pallas as pl
from jax.experimental.pallas import tpu as pltpu


# Per-x-buffer byte target and scoped-VMEM limit. 2 x 16 MiB double-buffered x tiles
# + the tiny resident weight/output stay under 48 MiB, which is safe on every
# generation (v7x has only 64 MiB VMEM per TensorCore; v5e/v6e have 128 MiB but a
# 16/32 MiB *default* scoped limit, hence the explicit override).
_X_BUFFER_BYTES = 16 * 1024 * 1024
_VMEM_LIMIT_BYTES = 48 * 1024 * 1024


def _single_neuron_kernel(x_ref, w_ref, b_ref, o_ref):
    # VPU elementwise multiply against the lane-dense resident (1, D) weight row
    # (broadcast over the tile's rows), then an XLU lane reduce per row.
    # Keeps the MXU out of the loop entirely -- this op is pure HBM streaming.
    w_row = w_ref[...]                                            # (1, D), resident
    z = jnp.sum(x_ref[...] * w_row, axis=-1, keepdims=True)      # (TB, 1) f32
    z = z + b_ref[0]                                              # scalar bias (SMEM)
    o_ref[...] = jnp.maximum(z, 0.0).astype(o_ref.dtype)          # ReLU


def _pick_batch_tile(batch, d):
    """Batch-tile size: multiple of 8 (or the full batch), sized so one x buffer is
    ~<= 16 MiB, and capped so the grid keeps >= ~8 tiles when the batch allows it
    (v7x megacore sharding + deep per-core DMA streams)."""
    if batch <= 8:
        return batch
    tb = _X_BUFFER_BYTES // max(4 * d, 1)
    tb = max(8, (tb // 8) * 8)
    tb = min(tb, batch)
    if batch >= 64:
        # Keep at least ~8 batch tiles so the "parallel" axis shards across both
        # TensorCores on v7x (neutral on single-TC v5e/v6e).
        cap = ((pl.cdiv(batch, 8) + 7) // 8) * 8
        tb = min(tb, cap)
    return tb


def _single_neuron_pallas(x, w, b):
    """Pallas forward: x (B, D) f32, w (1, D) f32, b (1,) f32 -> (B, 1) f32."""
    B, D = x.shape
    tb = _pick_batch_tile(B, D)
    grid = (pl.cdiv(B, tb),)
    return pl.pallas_call(
        _single_neuron_kernel,
        out_shape=jax.ShapeDtypeStruct((B, 1), jnp.float32),
        grid_spec=pl.GridSpec(
            grid=grid,
            in_specs=[
                # x streamed over batch tiles (auto double-buffered HBM->VMEM).
                pl.BlockSpec((tb, D), lambda i: (i, 0)),
                # weight: lane-dense row, grid-invariant -> DMA'd once, VMEM-resident.
                pl.BlockSpec((1, D), lambda i: (0, 0)),
                # bias: scalar in SMEM.
                pl.BlockSpec(memory_space=pltpu.MemorySpace.SMEM),
            ],
            # Output column is (tb, 1) -> masked stores, but output bytes are
            # negligible vs the x stream; lane-dense relayout intentionally skipped.
            out_specs=pl.BlockSpec((tb, 1), lambda i: (i, 0)),
        ),
        compiler_params=pltpu.CompilerParams(
            dimension_semantics=("parallel",),
            vmem_limit_bytes=_VMEM_LIMIT_BYTES,
        ),
        cost_estimate=pl.CostEstimate(
            flops=2 * B * D,
            bytes_accessed=4 * (B * D + D + B),
            transcendentals=0,
        ),
    )(x, w, b)


def single_neuron_classifier(x, w, b, *, force_pallas=False, min_pallas_rows=4096):
    """Forward pass of SingleNeuronClassifier (actfunction='relu').

    x: (B, D) f32, w: (1, D) f32 (nn.Linear weight layout), b: (1,) f32.
    Returns squeeze(relu(x @ w.T + b)) -- matches `self.fc(I).squeeze()`.
    """
    B, D = x.shape
    too_wide = 8 * D * 4 > _X_BUFFER_BYTES  # even an 8-row tile would blow the budget
    if (force_pallas or B >= min_pallas_rows) and not too_wide:
        out = _single_neuron_pallas(x, w, b)
    else:
        # Tiny problems (pallas_call launch overhead dominates) and extremely wide
        # feature dims go through the fused XLA path.
        # TODO(synk): add a D-tiled variant (extra "arbitrary" grid axis + f32
        # accumulator scratch) for num_inputs so large that an 8-row tile > 16 MiB.
        out = jnp.maximum(x @ w.T + b, 0.0)
    # torch `.squeeze()` removes all size-1 dims (the trailing 1; B=1 would give 0-d).
    return jnp.squeeze(out)


if __name__ == "__main__":
    # Small shapes consistent with the module: num_inputs=32 features, batch=8.
    B, D = 8, 32
    key = jax.random.PRNGKey(0)
    kx, kw, kb = jax.random.split(key, 3)

    x = jax.random.normal(kx, (B, D), dtype=jnp.float32)

    # Parameter init mimicking nn.Linear default: U(-1/sqrt(fan_in), 1/sqrt(fan_in)).
    bound = 1.0 / jnp.sqrt(jnp.float32(D))
    w = jax.random.uniform(kw, (1, D), dtype=jnp.float32, minval=-bound, maxval=bound)
    b = jax.random.uniform(kb, (1,), dtype=jnp.float32, minval=-bound, maxval=bound)

    # Force the Pallas path so the kernel itself is exercised at the demo shape.
    out = single_neuron_classifier(x, w, b, force_pallas=True)
    out = jax.block_until_ready(out)

    # Reference: plain-JAX fused forward (same math the dispatch wrapper uses).
    ref = jnp.squeeze(jnp.maximum(x @ w.T + b, 0.0))
    assert out.shape == (B,), out.shape
    assert jnp.allclose(out, ref, atol=1e-5, rtol=1e-5)

    # Also sanity-check the dispatching wrapper (XLA path at this size) agrees.
    out_dispatch = jax.block_until_ready(single_neuron_classifier(x, w, b))
    assert jnp.allclose(out_dispatch, ref, atol=1e-5, rtol=1e-5)

    print("KERNEL_OK")
</pallas_src>

<mosaic_0001>
module attributes {stable_mosaic.version = 11 : i64} {
  func.func @_single_neuron_kernel(%arg0: i32, %arg1: memref<8x32xf32, #tpu.memory_space<vmem>>, %arg2: memref<1x32xf32, #tpu.memory_space<vmem>>, %arg3: memref<1xf32, #tpu.memory_space<smem>>, %arg4: memref<8x1xf32, #tpu.memory_space<vmem>>) attributes {dimension_semantics = [#tpu.dimension_semantics<parallel>], iteration_bounds = array<i64: 1>, scalar_prefetch = 0 : i64, scratch_operands = 0 : i64, tpu.core_type = #tpu.core_type<tc>, window_params = [{transform_indices = @transform_0, window_bounds = array<i64: 8, 32>}, {pipeline_mode = #tpu.pipeline_mode<synchronous>, transform_indices = @transform_1, window_bounds = array<i64: 1, 32>}, {transform_indices = @transform_2, window_bounds = array<i64: 1>}, {transform_indices = @transform_3, window_bounds = array<i64: 8, 1>}]} {
    %c0 = arith.constant 0 : index
    %c0_0 = arith.constant 0 : index
    %0 = vector.load %arg2[%c0, %c0_0] : memref<1x32xf32, #tpu.memory_space<vmem>>, vector<1x32xf32>
    %c0_1 = arith.constant 0 : index
    %c0_2 = arith.constant 0 : index
    %1 = vector.load %arg1[%c0_1, %c0_2] : memref<8x32xf32, #tpu.memory_space<vmem>>, vector<8x32xf32>
    %2 = vector.broadcast %0 : vector<1x32xf32> to vector<8x32xf32>
    %3 = arith.mulf %1, %2 : vector<8x32xf32>
    %cst = arith.constant dense<0.000000e+00> : vector<8xf32>
    %4 = vector.multi_reduction <add>, %3, %cst [1] : vector<8x32xf32> to vector<8xf32>
    %5 = vector.shape_cast %4 : vector<8xf32> to vector<8x1xf32>
    %c0_3 = arith.constant 0 : index
    %6 = memref.load %arg3[%c0_3] : memref<1xf32, #tpu.memory_space<smem>>
    %7 = vector.broadcast %6 : f32 to vector<8x1xf32>
    %8 = arith.addf %5, %7 : vector<8x1xf32>
    %cst_4 = arith.constant 0.000000e+00 : f32
    %9 = vector.broadcast %cst_4 : f32 to vector<8x1xf32>
    %10 = arith.maximumf %8, %9 : vector<8x1xf32>
    %c0_5 = arith.constant 0 : index
    %c0_6 = arith.constant 0 : index
    %11 = vector.load %arg4[%c0_5, %c0_6] : memref<8x1xf32, #tpu.memory_space<vmem>>, vector<8x1xf32>
    tpu.vector_store %arg4[%c0_5, %c0_6], %10 {strides = array<i32>} : memref<8x1xf32, #tpu.memory_space<vmem>>, vector<8x1xf32>,
    return
  }
  func.func @transform_0(%arg0: i32) -> (i32, i32) {
    %c0_i32 = arith.constant 0 : i32
    %c0_i32_0 = arith.constant 0 : i32
    return %arg0, %c0_i32 : i32, i32
  }
  func.func @transform_1(%arg0: i32) -> (i32, i32) {
    %c0_i32 = arith.constant 0 : i32
    %c0_i32_0 = arith.constant 0 : i32
    %c0_i32_1 = arith.constant 0 : i32
    return %c0_i32, %c0_i32_0 : i32, i32
  }
  func.func @transform_2(%arg0: i32) -> i32 {
    %c0_i32 = arith.constant 0 : i32
    %c0_i32_0 = arith.constant 0 : i32
    return %c0_i32 : i32
  }
  func.func @transform_3(%arg0: i32) -> (i32, i32) {
    %c0_i32 = arith.constant 0 : i32
    %c0_i32_0 = arith.constant 0 : i32
    return %arg0, %c0_i32 : i32, i32
  }
}

</mosaic_0001>

<bundles_post_ra>
// kernel: tpu_custom_call.1
= control target key start
LH: loop header
LB: loop body
LE: loop exit
PB: predicated region body
PF: predicated region fallthrough
CT: control target
= control target key end

     0   :  { %9 = vsyncpa [#allocation4], 0  ;;  %s78_s15 = smov [#allocation3]   ;;  %s111_s0 = inlined_call_operand.hbm [shape: f32[8,32], index: 0, kind: input, shape index: {}]   ;;  %s112_s1 = inlined_call_operand.vmem [shape: f32[1,32], index: 1, kind: input, shape index: {}]   ;;  %s113_s2 = inlined_call_operand.<no memory space> [shape: f32[1], index: 2, kind: input, shape index: {}]   ;;  %s114_s3 = inlined_call_operand.vmem [shape: f32[8,1], index: 3, kind: output, shape index: {}]  }
   0x1   :  { %s15_s14 = sshll.u32 %s111_s0, 4  ;;  %s17_s16 = sshll.u32 %s78_s15, 4  ;;  %s16_s14 = int_to_ptr.hbm [resolvable:$true] %s15_s14  ;;  %s18_s16 = int_to_ptr.vmem [resolvable:$true] %s17_s16 }
   0x2   :  { %20 = dma.hbm_to_vmem [thread:$0]  %s16_s14, 128, %s18_s16, [#allocation4]  }
   0x3   :  { %76 = dma.done.wait [#allocation4], 128  }
   0x4   :  { %77 = vsyncadd [#allocation4], 4294967168  ;;  %v30_v0 = vld [vmem:[#allocation3] sm:$0xff]  ;;  %vm35_vm0 = vcmask 261120   ;;  %v40_v4 = vstv %s113_s2  ;;  %vm43_vm1 = vcmask 7168  }
   0x5   :  { %v51_v1 = vld [vmem:[%s112_s1] ss:$0 sm:$0xff] }
   0x6   :  { %v34_v2 = vmul.f32 %v51_v1, %v30_v0 }
   0x8   :  { %v36_v3 = vsel %vm35_vm0, %v34_v2, 0.0 }
   0x9   :  { %37 = vadd.xlane.f32.xlu0 %v36_v3 }
  0x7c   :  { %v38_v5 = vpop.xlane.xlu0 %37 }
  0x7d   :  { %v41_v6 = vadd.f32 %v40_v4, %v38_v5 }
  0x7f   :  { %v42_v7 = vmax.f32 %v41_v6, 0.0 }
  0x81   :  { %44 = vst.msk [vmem:[%s114_s3] sm:$0xff] %vm43_vm1, %v42_v7 }
  0x82   :  { %49 = vsyncpa [#allocation4], 1 }

</bundles_post_ra>
